<compile_context>
chip_gen: v7x
topology: tpu7x:2x2x1
jax: 0.10.0
libtpu: 0.0.40
codegen_flags: <defaults>
</compile_context>

<pallas_src>
import jax
import jax.numpy as jnp
import numpy as np
from jax.experimental import pallas as pl
from jax.experimental.pallas import tpu as pltpu

GRAPH_SIZE = 8          # N: number of graph nodes (== adjacency width)
INPUT_SIZE = 16         # F_in
HIDDEN_SIZE = 32        # F_hidden
OUTPUT_SIZE = 8         # F_out
BATCH = 2


def _gcn_encoder_kernel(a_ref, x_ref, w1_ref, w2_ref, out_ref):
    """One grid step: TB graphs -> TB node-0 embeddings.

    a_ref : (TB, N, N)     adjacency rows
    x_ref : (TB, N, F_in)  node features
    w1_ref: (F_in, H)      conv1 weight
    w2_ref: (H, F_out)     conv2 weight
    out_ref: (TB, F_out)   node-0 output features per graph
    """
    A = a_ref[...].astype(jnp.float32)            # (TB, N, N)
    Xf = x_ref[...].astype(jnp.float32)           # (TB, N, F_in)
    tb, n, f_in = Xf.shape
    hidden = w1_ref.shape[1]

    # --- symmetric normalization: D^{-1/2} (A + I) D^{-1/2}, D = diag(rowsum(A))
    #     (torch: pinv(diag(d)).sqrt() == 1/sqrt(d) where d > 0 else 0)
    eye = jnp.eye(n, dtype=jnp.float32)           # hoisted: built once per step
    d = jnp.sum(A, axis=-1, keepdims=True)        # (TB, N, 1)
    d_inv_sqrt = jnp.where(d > 0.0, jax.lax.rsqrt(d), 0.0)
    a_hat = (A + eye[None]) * d_inv_sqrt * jnp.swapaxes(d_inv_sqrt, -1, -2)

    # --- GCNConv layer 1: relu(A_hat @ (Xf @ W1)) ---
    # Flattened weight matmul: M = TB*N fills the MXU M dimension; the tiny
    # (N x N) A_hat contraction stays a batched einsum (VPU/XLU-side), keeping
    # the MXU slot for the big weight matmuls.
    xw = jnp.dot(Xf.reshape(tb * n, f_in), w1_ref[...],
                 preferred_element_type=jnp.float32)              # (TB*N, H)
    h = jnp.einsum('bij,bjf->bif', a_hat, xw.reshape(tb, n, hidden),
                   preferred_element_type=jnp.float32)            # (TB, N, H)
    h = jnp.maximum(h, 0.0)

    # --- GCNConv layer 2: only node 0 of Z is ever returned downstream ---
    # The adjacency block of conv1's output is the original A, so A_hat is
    # reused.  row0[b, :] = A_hat[b, 0, :] @ h[b]  (VPU broadcast-mul + reduce).
    row0 = jnp.sum(a_hat[:, 0, :, None] * h, axis=1)              # (TB, H)
    z0 = jnp.dot(row0, w2_ref[...],
                 preferred_element_type=jnp.float32)              # (TB, F_out)
    out_ref[...] = jnp.maximum(z0, 0.0)


def _pick_batch_tile(batch, n, f_in, hidden, f_out):
    """Largest per-step batch tile whose f32 footprint (double-buffered inputs
    plus intermediates) fits comfortably under the scoped-VMEM request.
    Returns either the full batch (single grid step) or a multiple of 8 that
    divides the batch (keeps the (TB, F_out) output block sublane-aligned)."""
    budget = 20 * 1024 * 1024                     # headroom under 32 MiB scoped
    per_graph = 4 * (2 * (n * n + n * f_in)       # A, Xf (x2 double-buffered)
                     + n * n                      # A_hat
                     + 3 * n * hidden             # xw / h / temps
                     + 2 * f_out)                 # output (x2)
    cap = max(1, budget // per_graph)
    if batch <= cap:
        return batch                              # whole batch in one grid step
    tb = (min(cap, batch) // 8) * 8
    while tb > 8 and batch % tb:
        tb -= 8
    if tb >= 8 and batch % tb == 0:
        return tb
    return 1


@jax.jit
def gcn_encoder(x, w1, w2):
    """x: (B, N, N + F_in) = [adjacency || features], w1: (F_in, H),
    w2: (H, F_out)  ->  (B, 1, F_out), matching GCNEncoder.forward."""
    B, N, tot = x.shape
    f_in = tot - N
    hidden = w1.shape[1]
    f_out = w2.shape[1]

    # Split outside the kernel: separate, lane-aligned inputs (no in-kernel
    # slicing of the concatenated 24-wide block).
    A = x[:, :, :N]
    Xf = x[:, :, N:]

    tb = _pick_batch_tile(B, N, f_in, hidden, f_out)
    grid = (B // tb,)

    out2d = pl.pallas_call(
        _gcn_encoder_kernel,
        out_shape=jax.ShapeDtypeStruct((B, f_out), jnp.float32),
        grid=grid,
        in_specs=[
            pl.BlockSpec((tb, N, N), lambda b: (b, 0, 0)),
            pl.BlockSpec((tb, N, f_in), lambda b: (b, 0, 0)),
            pl.BlockSpec((f_in, hidden), lambda b: (0, 0)),
            pl.BlockSpec((hidden, f_out), lambda b: (0, 0)),
        ],
        out_specs=pl.BlockSpec((tb, f_out), lambda b: (b, 0)),
        compiler_params=pltpu.CompilerParams(
            dimension_semantics=("parallel",),
            vmem_limit_bytes=32 * 1024 * 1024,
        ),
    )(A, Xf, w1, w2)

    # TODO(synk): for very large batch tiles, pack results into a lane-dense
    # (TB/16, 16*F_out) slab before the store to avoid masked partial stores.
    return out2d[:, None, :]                      # (B, 1, F_out)


def _reference(x, w1, w2):
    """Pure-JAX reference mirroring the PyTorch forward (float32)."""
    N = GRAPH_SIZE

    def conv(X, W):
        A = X[:, :, :N]
        Xf = X[:, :, N:]
        d = jnp.sum(A, axis=2)
        d_is = jnp.where(d > 0.0, 1.0 / jnp.sqrt(d), 0.0)
        A_hat = (A + jnp.eye(N)[None]) * d_is[:, :, None] * d_is[:, None, :]
        out = jax.nn.relu(A_hat @ Xf @ W)
        return jnp.concatenate([A, out], axis=2)

    Z = conv(conv(x, w1), w2)
    return Z[:, 0:1, N:]


if __name__ == "__main__":
    key = jax.random.PRNGKey(0)
    kx, ka, k1, k2 = jax.random.split(key, 4)

    # Adjacency block: random 0/1 matrix; feature block: uniform.
    A = (jax.random.uniform(ka, (BATCH, GRAPH_SIZE, GRAPH_SIZE)) > 0.5
         ).astype(jnp.float32)
    feats = jax.random.uniform(kx, (BATCH, GRAPH_SIZE, INPUT_SIZE),
                               dtype=jnp.float32)
    x = jnp.concatenate([A, feats], axis=2)       # (B, N, N + F_in)

    # torch.rand(in, out) -> uniform[0, 1) weights, deterministic here.
    w1 = jax.random.uniform(k1, (INPUT_SIZE, HIDDEN_SIZE), dtype=jnp.float32)
    w2 = jax.random.uniform(k2, (HIDDEN_SIZE, OUTPUT_SIZE), dtype=jnp.float32)

    out = jax.block_until_ready(gcn_encoder(x, w1, w2))

    ref = _reference(x, w1, w2)
    np.testing.assert_allclose(np.asarray(out), np.asarray(ref),
                               rtol=1e-5, atol=1e-4)
    assert out.shape == (BATCH, 1, OUTPUT_SIZE)
    print("KERNEL_OK")
</pallas_src>

<mosaic_0001>
module attributes {stable_mosaic.version = 11 : i64} {
  func.func @_gcn_encoder_kernel(%arg0: i32, %arg1: memref<2x8x8xf32, #tpu.memory_space<vmem>>, %arg2: memref<2x8x16xf32, #tpu.memory_space<vmem>>, %arg3: memref<16x32xf32, #tpu.memory_space<vmem>>, %arg4: memref<32x8xf32, #tpu.memory_space<vmem>>, %arg5: memref<2x8xf32, #tpu.memory_space<vmem>>) attributes {dimension_semantics = [#tpu.dimension_semantics<parallel>], iteration_bounds = array<i64: 1>, scalar_prefetch = 0 : i64, scratch_operands = 0 : i64, tpu.core_type = #tpu.core_type<tc>, window_params = [{transform_indices = @transform_0, window_bounds = array<i64: 2, 8, 8>}, {transform_indices = @transform_1, window_bounds = array<i64: 2, 8, 16>}, {pipeline_mode = #tpu.pipeline_mode<synchronous>, transform_indices = @transform_2, window_bounds = array<i64: 16, 32>}, {pipeline_mode = #tpu.pipeline_mode<synchronous>, transform_indices = @transform_3, window_bounds = array<i64: 32, 8>}, {transform_indices = @transform_4, window_bounds = array<i64: 2, 8>}]} {
    %c0 = arith.constant 0 : index
    %c0_0 = arith.constant 0 : index
    %c0_1 = arith.constant 0 : index
    %0 = vector.load %arg1[%c0, %c0_0, %c0_1] : memref<2x8x8xf32, #tpu.memory_space<vmem>>, vector<2x8x8xf32>
    %c0_2 = arith.constant 0 : index
    %c0_3 = arith.constant 0 : index
    %c0_4 = arith.constant 0 : index
    %1 = vector.load %arg2[%c0_2, %c0_3, %c0_4] : memref<2x8x16xf32, #tpu.memory_space<vmem>>, vector<2x8x16xf32>
    %2 = tpu.iota {dimensions = array<i32: 0>} : vector<8x8xi32>
    %3 = tpu.iota {dimensions = array<i32: 1>} : vector<8x8xi32>
    %c0_i32 = arith.constant 0 : i32
    %4 = vector.broadcast %c0_i32 : i32 to vector<8x8xi32>
    %5 = arith.addi %2, %4 : vector<8x8xi32>
    %6 = arith.cmpi eq, %5, %3 : vector<8x8xi32>
    %7 = arith.extui %6 : vector<8x8xi1> to vector<8x8xi32>
    %8 = arith.sitofp %7 : vector<8x8xi32> to vector<8x8xf32>
    %cst = arith.constant dense<0.000000e+00> : vector<2x8xf32>
    %9 = vector.multi_reduction <add>, %0, %cst [2] : vector<2x8x8xf32> to vector<2x8xf32>
    %10 = vector.shape_cast %9 : vector<2x8xf32> to vector<2x8x1xf32>
    %cst_5 = arith.constant 0.000000e+00 : f32
    %11 = vector.broadcast %cst_5 : f32 to vector<2x8x1xf32>
    %12 = arith.cmpf ogt, %10, %11 : vector<2x8x1xf32>
    %13 = math.rsqrt %10 : vector<2x8x1xf32>
    %cst_6 = arith.constant 0.000000e+00 : f32
    %14 = vector.broadcast %cst_6 : f32 to vector<2x8x1xf32>
    %15 = arith.select %12, %13, %14 : vector<2x8x1xi1>, vector<2x8x1xf32>
    %16 = vector.shape_cast %8 : vector<8x8xf32> to vector<1x8x8xf32>
    %17 = vector.broadcast %16 : vector<1x8x8xf32> to vector<2x8x8xf32>
    %18 = arith.addf %0, %17 : vector<2x8x8xf32>
    %19 = vector.broadcast %15 : vector<2x8x1xf32> to vector<2x8x8xf32>
    %20 = arith.mulf %18, %19 : vector<2x8x8xf32>
    %21 = tpu.transpose %15, [0, 2, 1] : vector<2x8x1xf32> -> vector<2x1x8xf32>
    %22 = vector.broadcast %21 : vector<2x1x8xf32> to vector<2x8x8xf32>
    %23 = arith.mulf %20, %22 : vector<2x8x8xf32>
    %24 = vector.shape_cast %1 : vector<2x8x16xf32> to vector<16x16xf32>
    %c0_7 = arith.constant 0 : index
    %c0_8 = arith.constant 0 : index
    %25 = vector.load %arg3[%c0_7, %c0_8] : memref<16x32xf32, #tpu.memory_space<vmem>>, vector<16x32xf32>
    %cst_9 = arith.constant dense<0.000000e+00> : vector<16x32xf32>
    %26 = tpu.matmul %24, %25, %cst_9 {dimension_numbers = #tpu.dot_dimension_numbers<[1], [0], [0], [1], [0, 0, 1, 1], [], []>} : vector<16x16xf32>, vector<16x32xf32>, vector<16x32xf32> -> vector<16x32xf32>
    %27 = vector.shape_cast %26 : vector<16x32xf32> to vector<2x8x32xf32>
    "tpu.trace_start"() <{level = 10 : i32, message = "bij,bjf->bif"}> : () -> ()
    %cst_10 = arith.constant dense<0.000000e+00> : vector<2x8x32xf32>
    %28 = tpu.matmul %23, %27, %cst_10 {dimension_numbers = #tpu.dot_dimension_numbers<[2], [1], [1], [2], [0, 0, 0, 1, 1, 2], [0], [0]>} : vector<2x8x8xf32>, vector<2x8x32xf32>, vector<2x8x32xf32> -> vector<2x8x32xf32>
    "tpu.trace_stop"() : () -> ()
    %cst_11 = arith.constant 0.000000e+00 : f32
    %29 = vector.broadcast %cst_11 : f32 to vector<2x8x32xf32>
    %30 = arith.maximumf %28, %29 : vector<2x8x32xf32>
    %31 = vector.extract_strided_slice %23 {offsets = [0, 0, 0], sizes = [2, 1, 8], strides = [1, 1, 1]} : vector<2x8x8xf32> to vector<2x1x8xf32>
    %32 = vector.shape_cast %31 : vector<2x1x8xf32> to vector<2x8xf32>
    %33 = vector.shape_cast %32 : vector<2x8xf32> to vector<2x8x1xf32>
    %34 = vector.broadcast %33 : vector<2x8x1xf32> to vector<2x8x32xf32>
    %35 = arith.mulf %34, %30 : vector<2x8x32xf32>
    %cst_12 = arith.constant dense<0.000000e+00> : vector<2x32xf32>
    %36 = vector.multi_reduction <add>, %35, %cst_12 [1] : vector<2x8x32xf32> to vector<2x32xf32>
    %c0_13 = arith.constant 0 : index
    %c0_14 = arith.constant 0 : index
    %37 = vector.load %arg4[%c0_13, %c0_14] : memref<32x8xf32, #tpu.memory_space<vmem>>, vector<32x8xf32>
    %cst_15 = arith.constant dense<0.000000e+00> : vector<2x8xf32>
    %38 = tpu.matmul %36, %37, %cst_15 {dimension_numbers = #tpu.dot_dimension_numbers<[1], [0], [0], [1], [0, 0, 1, 1], [], []>} : vector<2x32xf32>, vector<32x8xf32>, vector<2x8xf32> -> vector<2x8xf32>
    %cst_16 = arith.constant 0.000000e+00 : f32
    %39 = vector.broadcast %cst_16 : f32 to vector<2x8xf32>
    %40 = arith.maximumf %38, %39 : vector<2x8xf32>
    %c0_17 = arith.constant 0 : index
    %c0_18 = arith.constant 0 : index
    %41 = vector.load %arg5[%c0_17, %c0_18] : memref<2x8xf32, #tpu.memory_space<vmem>>, vector<2x8xf32>
    tpu.vector_store %arg5[%c0_17, %c0_18], %40 {strides = array<i32>} : memref<2x8xf32, #tpu.memory_space<vmem>>, vector<2x8xf32>,
    return
  }
  func.func @transform_0(%arg0: i32) -> (i32, i32, i32) {
    %c0_i32 = arith.constant 0 : i32
    %c0_i32_0 = arith.constant 0 : i32
    %c0_i32_1 = arith.constant 0 : i32
    return %arg0, %c0_i32, %c0_i32_0 : i32, i32, i32
  }
  func.func @transform_1(%arg0: i32) -> (i32, i32, i32) {
    %c0_i32 = arith.constant 0 : i32
    %c0_i32_0 = arith.constant 0 : i32
    %c0_i32_1 = arith.constant 0 : i32
    return %arg0, %c0_i32, %c0_i32_0 : i32, i32, i32
  }
  func.func @transform_2(%arg0: i32) -> (i32, i32) {
    %c0_i32 = arith.constant 0 : i32
    %c0_i32_0 = arith.constant 0 : i32
    %c0_i32_1 = arith.constant 0 : i32
    return %c0_i32, %c0_i32_0 : i32, i32
  }
  func.func @transform_3(%arg0: i32) -> (i32, i32) {
    %c0_i32 = arith.constant 0 : i32
    %c0_i32_0 = arith.constant 0 : i32
    %c0_i32_1 = arith.constant 0 : i32
    return %c0_i32, %c0_i32_0 : i32, i32
  }
  func.func @transform_4(%arg0: i32) -> (i32, i32) {
    %c0_i32 = arith.constant 0 : i32
    %c0_i32_0 = arith.constant 0 : i32
    return %arg0, %c0_i32 : i32, i32
  }
}

</mosaic_0001>

<bundles_post_ra>
// kernel: gcn_encoder.1
= control target key start
LH: loop header
LB: loop body
LE: loop exit
PB: predicated region body
PF: predicated region fallthrough
CT: control target
= control target key end

     0   :  { %vm29_vm0 = vcmask 64512   ;;  %vm122_vm1 = vcmask 130048   ;;  %v569_v6 = vmov 0.0   ;;  %s650_s0 = inlined_call_operand.vmem [shape: f32[2,8,8], index: 0, kind: input, shape index: {}]   ;;  %s651_s1 = inlined_call_operand.vmem [shape: f32[2,8,16], index: 1, kind: input, shape index: {}]   ;;  %s652_s2 = inlined_call_operand.vmem [shape: f32[16,32], index: 2, kind: input, shape index: {}]   ;;  %s653_s3 = inlined_call_operand.vmem [shape: f32[32,8], index: 3, kind: input, shape index: {}]   ;;  %s654_s4 = inlined_call_operand.hbm [shape: f32[2,8], index: 4, kind: output, shape index: {}]  }
   0x1   :  { %v18_v0 = vld [vmem:[%s650_s0] sm:$0xff]  ;;  %v19_v1 = vld [vmem:[%s650_s0 + $0x8] sm:$0xff]  ;;  %506 = vmatprep.subr.mxu1 %v569_v6 }
   0x2   :  { %v120_v2 = vld [vmem:[%s652_s2] sm:$0xff]  ;;  %v30_v3 = vsel %vm29_vm0, %v18_v0, 0.0  ;;  %v121_v4 = vld [vmem:[%s652_s2 + $0x8] sm:$0xff] }
   0x3   :  { %v20_v5 = vld [vmem:[%s651_s1] sm:$0xff]  ;;  %31 = vadd.xlane.f32.xlu0 %v30_v3  ;;  %v527_v7 = vpack.c.bf16 %v121_v4, %v120_v2 }
   0x4   :  { %503 = vmatprep.mubr.msk.f32.mxu0 %vm122_vm1, %v20_v5 }
   0x5   :  { %9 = vsyncpa [#allocation3], 0  ;;  %v33_v8 = vsel %vm29_vm0, %v19_v1, 0.0  ;;  %528 = vmatprep.subr.bf16.mxu0 %v527_v7  ;;  %v21_v9 = vld [vmem:[%s651_s1 + $0x8] sm:$0xff]  ;;  %v22_v10 = vlaneseq  ;;  %vm570_vm5 = vmmov 0   ;;  %v383_v35 = vld [vmem:[%s653_s3] sm:$0xff] }
   0x6   :  { %530 = vmatpush3.bf16.msra.mxu0 %v527_v7  ;;  %508 = vmatprep.mubr.msk.f32.mxu1 %vm570_vm5, %v569_v6  ;;  %v384_v36 = vld [vmem:[%s653_s3 + $0x8] sm:$0xff]  ;;  %v571_v38 = vmov 0.0|0.0   ;;  %v385_v39 = vld [vmem:[%s653_s3 + $0x10] sm:$0xff]  ;;  %v386_v40 = vld [vmem:[%s653_s3 + $0x18] sm:$0xff]  ;;  %vm368_vm6 = vcmask 261120   ;;  %vm389_vm7 = vcmask 1041409  }
   0x7   :  { %34 = vadd.xlane.f32.xlu0 %v33_v8  ;;  %v23_v11 = vshrl.u32 %v22_v10, 7  ;;  %v25_v12 = vand.u32 127, %v22_v10  ;;  %v532_v37 = vpack.c.bf16 %v384_v36, %v383_v35  ;;  %531 = vmatprep.subr.bf16.mxu0 %v571_v38  ;;  %v535_v41 = vpack.c.bf16 %v386_v40, %v385_v39  ;;  %s572_s3 = smov [#allocation2]  }
   0x8   :  { %s472_s6 = sshll.u32 %s572_s3, 4  ;;  %vm464_vm8 = vcmask 58368   ;;  %s473_s6 = int_to_ptr.vmem [resolvable:$true] %s472_s6 }
   0x9   :  { %504 = vmatmul.mubr.msk.f32.vlgmr.msra.gmra.mrb[0].mxu0 %vm122_vm1, %v21_v9  ;;  %vm26_vm2 = vcmp.eq.s32.totalorder %v23_v11, %v25_v12  ;;  %v112_v26 = vsub.s32 0, %v23_v11  ;;  %s545_s7 = scalar_lea.vmem %s473_s6, 32  ;;  %p550_p1 = scmp.lt.s32.totalorder %s473_s6, %s473_s6 }
   0xa   :  { %v480_v15 = vsel %vm26_vm2, 1.0, %v569_v6  ;;  %524 = vmatprep.mubr.msk.f32.mxu0 %vm570_vm5, %v569_v6  ;;  %533 = vmatpush3.bf16.msra.mxu0 %v532_v37  ;;  %p546_p0 = scmp.ne.s32.totalorder %s473_s6, %s545_s7  ;;  %p551_p2 = scmp.lt.s32.totalorder %s545_s7, %s545_s7 }
   0xb   :  { %v42_v16 = vadd.f32 %v480_v15, %v18_v0  ;;  %v43_v19 = vadd.f32 %v480_v15, %v19_v1  ;;  %534 = vmatprep.subr.bf16.mxu0 %v571_v38 }
   0xc   :  { %p552_p3 = por %p551_p2, %p550_p1 }
   0xe   :  { %536 = vmatpush3.bf16.msra.mxu0 %v535_v41  ;;  %p553_p4 = pnand %p552_p3, %p546_p0 }
  0x90   :  { %v32_v13 = vpop.xlane.xlu0 %31 }
  0x91   :  { %541 = vrsqrt.f32 %v32_v13  ;;  %vm36_vm3 = vcmp.gt.f32.partialorder %v32_v13, 0.0 }
  0x94   :  { %v35_v14 = vpop.xlane.xlu0 %34 }
  0x95   :  { %543 = vrsqrt.f32 %v35_v14  ;;  %vm37_vm4 = vcmp.gt.f32.partialorder %v35_v14, 0.0 }
  0x9b   :  { %v542_v17 = vpop.eup %541 }
  0x9c   :  { %v40_v18 = vsel %vm36_vm3, %v542_v17, 0.0 }
  0x9d   :  { %46 = vxpose.xlu1.b32.start.end [1/1] (short) (narrow) %v40_v18, 8  ;;  %v44_v20 = vmul.f32 %v42_v16, %v40_v18 }
  0x9f   :  { %v544_v21 = vpop.eup %543 }
  0xa0   :  { %v41_v22 = vsel %vm37_vm4, %v544_v21, 0.0 }
  0xa1   :  { %78 = vxpose.xlu1.b32.start.end [1/1] (short) (narrow) %v41_v22, 8  ;;  %v45_v23 = vmul.f32 %v43_v19, %v41_v22 }
  0xdc   :  { %v505_v24 = vpop.f32.mrb[0].mxu0 }
  0xdd   :  { %v195_v25 = vpop.f32.mrb[1].mxu0 }
  0xde   :  { %507 = vmatpush3.msra.mxu1 %v195_v25 }
  0xdf   :  { %511 = vmatprep.subr.mxu1 %v569_v6 }
 0x11d   :  { %v62_v27 = vpop.trf.xlu1 }
 0x11e   :  { %v113_v28 = vrot.slane %v62_v27, %v112_v26 }
 0x120   :  { %v118_v29 = vmul.f32 %v113_v28, %v44_v20 }
 0x121   :  { %v94_v30 = vpop.trf.xlu1 }
 0x122   :  { %v117_v31 = vrot.slane %v94_v30, %v112_v26  ;;  %509 = vmatmul.mubr.msk.f32.vlgmr.msra.gmra.mrb[0].mxu1 %vm29_vm0, %v118_v29  ;;  %v355_v32 = vrot.slane %v118_v29, %v112_v26 }
 0x123   :  { %512 = vmatpush3.msra.mxu1 %v505_v24  ;;  %513 = vmatprep.mubr.msk.f32.mxu1 %vm570_vm5, %v569_v6 }
 0x124   :  { %v119_v33 = vmul.f32 %v117_v31, %v45_v23  ;;  %357 = vbcast.lane.b32.xlu0 %v355_v32, 256 }
 0x126   :  { %514 = vmatmul.mubr.msk.f32.vlgmr.msra.gmra.mrb[2].mxu1 %vm29_vm0, %v119_v33  ;;  %v362_v34 = vrot.slane %v119_v33, %v112_v26 }
 0x128   :  { %364 = vbcast.lane.b32.xlu1 %v362_v34, 256 }
 0x196   :  { %v358_v45 = vpop.permute.xlu0 %357 }
 0x19a   :  { %v365_v51 = vpop.permute.xlu1 %364 }
 0x1f5   :  { %v273_v42 = vpop.f32.mrb[0].mxu1 }
 0x1f6   :  { %v350_v43 = vmax.f32 %v273_v42, 0.0  ;;  %v510_v44 = vpop.f32.mrb[1].mxu1 }
 0x1f8   :  { %v366_v46 = vmul.f32 %v358_v45, %v350_v43 }
 0x1f9   :  { %v346_v47 = vpop.f32.mrb[2].mxu1 }
 0x1fa   :  { %v369_v48 = vsel %vm368_vm6, %v366_v46, 0.0  ;;  %v351_v49 = vmax.f32 %v346_v47, 0.0  ;;  %v515_v50 = vpop.f32.mrb[3].mxu1 }
 0x1fb   :  { %v370_v52 = vrot.slane %v369_v48, 4 }
 0x1fc   :  { %v367_v53 = vmul.f32 %v365_v51, %v351_v49 }
 0x1fd   :  { %v371_v54 = vadd.f32 %v370_v52, %v369_v48 }
 0x1fe   :  { %v376_v55 = vsel %vm368_vm6, %v367_v53, 0.0 }
 0x1ff   :  { %v372_v56 = vrot.slane %v371_v54, 2  ;;  %v377_v57 = vrot.slane %v376_v55, 4 }
 0x201   :  { %v373_v58 = vadd.f32 %v372_v56, %v371_v54  ;;  %v378_v59 = vadd.f32 %v377_v57, %v376_v55 }
 0x203   :  { %v379_v60 = vrot.slane %v378_v59, 2  ;;  %v374_v61 = vrot.slane %v373_v58, 1 }
 0x205   :  { %v380_v62 = vadd.f32 %v379_v60, %v378_v59  ;;  %v375_v0 = vadd.f32 %v374_v61, %v373_v58 }
 0x207   :  { %v381_v63 = vrot.slane %v380_v62, 1 }
 0x209   :  { %v382_v1 = vadd.f32 %v381_v63, %v380_v62 }
 0x20b   :  { %v390_v2 = vsel %vm389_vm7, %v382_v1, %v375_v0 }
 0x20c   :  { %525 = vmatmul.mubr.msk.f32.vlgmr.msra.gmra.mrb[2].mxu0 %vm368_vm6, %v390_v2 }
 0x2df   :  { %v459_v3 = vpop.f32.mrb[2].mxu0 }
 0x2e0   :  { %v463_v4 = vmax.f32 %v459_v3, 0.0  ;;  %v526_v5 = vpop.f32.mrb[3].mxu0 }
 0x2e2   :  { %465 = vst.msk [vmem:[#allocation2] sm:$0x3] %vm464_vm8, %v463_v4 }
 0x2e3   :  { %556 = shalt.err (!%p553_p4)
}
 0x2e4   :  { %s557_s10 = scalar_lea.hbm %s654_s4, 32 }
 0x2e5   :  { %p558_p5 = scmp.ne.s32.totalorder %s654_s4, %s557_s10  ;;  %p561_p6 = scmp.lt.u32.totalorder %s557_s10, %s654_s4 }
 0x2e7   :  { %p563_p7 = pnand %p561_p6, %p558_p5 }
 0x2e9   :  { %566 = shalt.err (!%p563_p7)
}
 0x2ea   :  { %475 = dma.vmem_to_hbm [thread:$0]  %s473_s6, 32, %s654_s4, [#allocation3]  }
 0x2eb   :  { %567 = dma.done.wait [#allocation3], 32  }
 0x2ec   :  { %568 = vsyncadd [#allocation3], 4294967264 }
 0x2ed   :  { %479 = vsyncpa [#allocation3], 1 }

</bundles_post_ra>
